<compile_context>
chip_gen: v6e
topology: v6e:2x2x1
jax: 0.10.0
libtpu: 0.0.40
codegen_flags: <defaults>
</compile_context>

<pallas_src>
import functools
import math

import jax
import jax.numpy as jnp
from jax.experimental import pallas as pl
from jax.experimental.pallas import tpu as pltpu


def _layer_norm(x, gamma, beta, eps):
    # TF-style LayerNorm (eps inside the sqrt); f32 math, rsqrt -> EUP slot.
    u = jnp.mean(x, axis=-1, keepdims=True)
    d = x - u
    s = jnp.mean(d * d, axis=-1, keepdims=True)
    return gamma * (d * jax.lax.rsqrt(s + eps)) + beta


def _embeddings_kernel(word_ref, vid_ref, tt_ref, pe_ref,
                       gw1_ref, bw1_ref, w1_ref, b1_ref, gw2_ref, bw2_ref,
                       gv1_ref, bv1_ref, wv_ref, bv_ref, gv2_ref, bv2_ref,
                       gf_ref, bf_ref,
                       o_ref, *, eps, matmul_dtype):
    f32 = jnp.float32

    # ---- word branch: LN -> Dropout(identity, eval) -> Linear -> ReLU -> LN
    wx = _layer_norm(word_ref[0].astype(f32),
                     gw1_ref[...].astype(f32), bw1_ref[...].astype(f32), eps)
    hw = jnp.dot(wx.astype(matmul_dtype), w1_ref[...].astype(matmul_dtype),
                 preferred_element_type=f32) + b1_ref[...].astype(f32)
    hw = jnp.maximum(hw, 0.0)
    hw = _layer_norm(hw, gw2_ref[...].astype(f32), bw2_ref[...].astype(f32), eps)

    # ---- video branch: LN -> Dropout(identity, eval) -> Linear -> ReLU -> LN
    vx = _layer_norm(vid_ref[0].astype(f32),
                     gv1_ref[...].astype(f32), bv1_ref[...].astype(f32), eps)
    hv = jnp.dot(vx.astype(matmul_dtype), wv_ref[...].astype(matmul_dtype),
                 preferred_element_type=f32) + bv_ref[...].astype(f32)
    hv = jnp.maximum(hv, 0.0)
    hv = _layer_norm(hv, gv2_ref[...].astype(f32), bv2_ref[...].astype(f32), eps)

    # ---- sum with token-type embedding + sinusoidal position encoding
    emb = hw + hv + tt_ref[0].astype(f32) + pe_ref[...].astype(f32)

    # ---- final LayerNorm; final dropout is inference-mode identity.
    # TODO(synk): training-mode dropout (PRNG + mask) not implemented.
    emb = _layer_norm(emb, gf_ref[...].astype(f32), bf_ref[...].astype(f32), eps)

    o_ref[0] = emb.astype(o_ref.dtype)


def bert_embeddings_with_video(input_ids, video_features, token_type_ids, params,
                               *, eps=1e-12, seq_tile=256,
                               matmul_dtype=jnp.float32, out_dtype=None):
    """input_ids: (N, L) int32; video_features: (N, L, Dv); token_type_ids: (N, L).
       Returns (N, L, H)."""
    N, L = input_ids.shape
    Dv = video_features.shape[-1]
    word_table = params["word_emb"]     # (vocab, Dw)  (row 0 == padding_idx)
    tt_table = params["tt_emb"]         # (type_vocab, H)
    pe = params["pe"]                   # (max_len, H)
    Dw = word_table.shape[-1]
    H = tt_table.shape[-1]

    # Data-dependent embedding gathers done with XLA outside the Pallas kernel.
    word_emb = jnp.take(word_table, input_ids, axis=0)    # (N, L, Dw)
    tt_emb = jnp.take(tt_table, token_type_ids, axis=0)   # (N, L, H)

    # Sequence tile: multiple of 8 (full L for small demos).
    TL = L if L <= seq_tile else seq_tile
    grid = (N, pl.cdiv(L, TL))

    def row_spec(d):
        return pl.BlockSpec((1, TL, d), lambda n, l: (n, l, 0))

    def pinned(shape):
        # Resident across the whole grid (constant block index -> no re-DMA).
        return pl.BlockSpec(shape, lambda n, l: (0,) * len(shape))

    r2 = lambda v: v.reshape(1, -1)

    in_specs = [
        row_spec(Dw),                                   # gathered word embeddings
        row_spec(Dv),                                   # video features
        row_spec(H),                                    # gathered token-type emb
        pl.BlockSpec((TL, H), lambda n, l: (l, 0)),     # position encoding rows
        pinned((1, Dw)), pinned((1, Dw)),               # word LN1 gamma/beta
        pinned((Dw, H)), pinned((1, H)),                # word Linear W, b
        pinned((1, H)), pinned((1, H)),                 # word LN2 gamma/beta
        pinned((1, Dv)), pinned((1, Dv)),               # video LN1 gamma/beta
        pinned((Dv, H)), pinned((1, H)),                # video Linear W, b
        pinned((1, H)), pinned((1, H)),                 # video LN2 gamma/beta
        pinned((1, H)), pinned((1, H)),                 # final LN gamma/beta
    ]
    out_specs = pl.BlockSpec((1, TL, H), lambda n, l: (n, l, 0))

    out_dtype = out_dtype or video_features.dtype

    return pl.pallas_call(
        functools.partial(_embeddings_kernel, eps=eps, matmul_dtype=matmul_dtype),
        out_shape=jax.ShapeDtypeStruct((N, L, H), out_dtype),
        grid=grid,
        in_specs=in_specs,
        out_specs=out_specs,
        compiler_params=pltpu.CompilerParams(
            dimension_semantics=("parallel", "parallel"),
            vmem_limit_bytes=48 * 1024 * 1024),
    )(
        word_emb, video_features, tt_emb, pe,
        r2(params["word_ln1_g"]), r2(params["word_ln1_b"]),
        params["word_w"], r2(params["word_b"]),
        r2(params["word_ln2_g"]), r2(params["word_ln2_b"]),
        r2(params["vid_ln1_g"]), r2(params["vid_ln1_b"]),
        params["vid_w"], r2(params["vid_b"]),
        r2(params["vid_ln2_g"]), r2(params["vid_ln2_b"]),
        r2(params["final_ln_g"]), r2(params["final_ln_b"]),
    )


def make_position_encoding(n_filters, max_len):
    position = jnp.arange(max_len, dtype=jnp.float32)[:, None]
    div_term = jnp.exp(jnp.arange(0, n_filters, 2, dtype=jnp.float32)
                       * -(math.log(10000.0) / n_filters))
    pe = jnp.zeros((max_len, n_filters), dtype=jnp.float32)
    pe = pe.at[:, 0::2].set(jnp.sin(position * div_term))
    pe = pe.at[:, 1::2].set(jnp.cos(position * div_term))
    return pe


def _reference(input_ids, video_features, token_type_ids, params, eps=1e-12):
    def ln(x, g, b):
        u = x.mean(-1, keepdims=True)
        s = ((x - u) ** 2).mean(-1, keepdims=True)
        return g * ((x - u) / jnp.sqrt(s + eps)) + b

    p = params
    we = jnp.take(p["word_emb"], input_ids, axis=0)
    we = ln(we, p["word_ln1_g"], p["word_ln1_b"])
    we = jnp.maximum(we @ p["word_w"] + p["word_b"], 0.0)
    we = ln(we, p["word_ln2_g"], p["word_ln2_b"])

    ve = ln(video_features, p["vid_ln1_g"], p["vid_ln1_b"])
    ve = jnp.maximum(ve @ p["vid_w"] + p["vid_b"], 0.0)
    ve = ln(ve, p["vid_ln2_g"], p["vid_ln2_b"])

    tt = jnp.take(p["tt_emb"], token_type_ids, axis=0)
    emb = we + ve + tt
    L = input_ids.shape[1]
    emb = emb + p["pe"][:L][None]
    emb = ln(emb, p["final_ln_g"], p["final_ln_b"])
    return emb


if __name__ == "__main__":
    # Small config consistent with the module.
    batch, seq = 2, 8
    vocab_size = 48
    word_vec_size = 64
    video_feature_size = 64
    hidden_size = 32
    type_vocab_size = 2
    max_position = 64
    eps = 1e-12

    key = jax.random.PRNGKey(0)
    ks = jax.random.split(key, 16)

    input_ids = jax.random.randint(ks[0], (batch, seq), 0, vocab_size,
                                   dtype=jnp.int32)
    video_features = jax.random.normal(ks[1], (batch, seq, video_feature_size),
                                       dtype=jnp.float32)
    token_type_ids = jax.random.randint(ks[2], (batch, seq), 0, type_vocab_size,
                                        dtype=jnp.int32)

    word_emb = jax.random.normal(ks[3], (vocab_size, word_vec_size),
                                 dtype=jnp.float32) * 0.02
    word_emb = word_emb.at[0].set(0.0)   # padding_idx=0

    def gb(k, d):  # LayerNorm params perturbed from the (ones, zeros) init
        k1, k2 = jax.random.split(k)
        return (1.0 + 0.1 * jax.random.normal(k1, (d,), jnp.float32),
                0.05 * jax.random.normal(k2, (d,), jnp.float32))

    gw1, bw1 = gb(ks[4], word_vec_size)
    gw2, bw2 = gb(ks[5], hidden_size)
    gv1, bv1 = gb(ks[6], video_feature_size)
    gv2, bv2 = gb(ks[7], hidden_size)
    gf, bf = gb(ks[8], hidden_size)

    params = dict(
        word_emb=word_emb,
        tt_emb=jax.random.normal(ks[9], (type_vocab_size, hidden_size),
                                 dtype=jnp.float32) * 0.02,
        pe=make_position_encoding(hidden_size, max_position),
        word_ln1_g=gw1, word_ln1_b=bw1,
        word_w=jax.random.normal(ks[10], (word_vec_size, hidden_size),
                                 dtype=jnp.float32) * 0.02,
        word_b=jax.random.normal(ks[11], (hidden_size,), jnp.float32) * 0.02,
        word_ln2_g=gw2, word_ln2_b=bw2,
        vid_ln1_g=gv1, vid_ln1_b=bv1,
        vid_w=jax.random.normal(ks[12], (video_feature_size, hidden_size),
                                dtype=jnp.float32) * 0.02,
        vid_b=jax.random.normal(ks[13], (hidden_size,), jnp.float32) * 0.02,
        vid_ln2_g=gv2, vid_ln2_b=bv2,
        final_ln_g=gf, final_ln_b=bf,
    )

    ref = _reference(input_ids, video_features, token_type_ids, params, eps=eps)

    # f32 MXU path: tight correctness check against the pure-JAX reference.
    out = bert_embeddings_with_video(input_ids, video_features, token_type_ids,
                                     params, eps=eps, matmul_dtype=jnp.float32)
    out = jax.block_until_ready(out)
    assert out.shape == (batch, seq, hidden_size)
    assert jnp.allclose(out, ref, atol=1e-4, rtol=1e-4)

    # bf16 MXU path (perf config from the review): bf16 matmul operands,
    # f32 accumulation + f32 LayerNorm math. Loose sanity check only.
    out_bf16 = bert_embeddings_with_video(input_ids, video_features,
                                          token_type_ids, params, eps=eps,
                                          matmul_dtype=jnp.bfloat16)
    out_bf16 = jax.block_until_ready(out_bf16)
    assert jnp.allclose(out_bf16, ref, atol=1e-1, rtol=1e-1)

    print("KERNEL_OK")
</pallas_src>

<mosaic_0001>
module attributes {stable_mosaic.version = 11 : i64} {
  func.func @_embeddings_kernel(%arg0: i32, %arg1: i32, %arg2: memref<1x8x64xf32, #tpu.memory_space<vmem>>, %arg3: memref<1x8x64xf32, #tpu.memory_space<vmem>>, %arg4: memref<1x8x32xf32, #tpu.memory_space<vmem>>, %arg5: memref<8x32xf32, #tpu.memory_space<vmem>>, %arg6: memref<1x64xf32, #tpu.memory_space<vmem>>, %arg7: memref<1x64xf32, #tpu.memory_space<vmem>>, %arg8: memref<64x32xf32, #tpu.memory_space<vmem>>, %arg9: memref<1x32xf32, #tpu.memory_space<vmem>>, %arg10: memref<1x32xf32, #tpu.memory_space<vmem>>, %arg11: memref<1x32xf32, #tpu.memory_space<vmem>>, %arg12: memref<1x64xf32, #tpu.memory_space<vmem>>, %arg13: memref<1x64xf32, #tpu.memory_space<vmem>>, %arg14: memref<64x32xf32, #tpu.memory_space<vmem>>, %arg15: memref<1x32xf32, #tpu.memory_space<vmem>>, %arg16: memref<1x32xf32, #tpu.memory_space<vmem>>, %arg17: memref<1x32xf32, #tpu.memory_space<vmem>>, %arg18: memref<1x32xf32, #tpu.memory_space<vmem>>, %arg19: memref<1x32xf32, #tpu.memory_space<vmem>>, %arg20: memref<1x8x32xf32, #tpu.memory_space<vmem>>) attributes {dimension_semantics = [#tpu.dimension_semantics<parallel>, #tpu.dimension_semantics<parallel>], iteration_bounds = array<i64: 2, 1>, scalar_prefetch = 0 : i64, scratch_operands = 0 : i64, tpu.core_type = #tpu.core_type<tc>, window_params = [{transform_indices = @transform_0, window_bounds = array<i64: 1, 8, 64>}, {transform_indices = @transform_1, window_bounds = array<i64: 1, 8, 64>}, {transform_indices = @transform_2, window_bounds = array<i64: 1, 8, 32>}, {transform_indices = @transform_3, window_bounds = array<i64: 8, 32>}, {pipeline_mode = #tpu.pipeline_mode<synchronous>, transform_indices = @transform_4, window_bounds = array<i64: 1, 64>}, {pipeline_mode = #tpu.pipeline_mode<synchronous>, transform_indices = @transform_5, window_bounds = array<i64: 1, 64>}, {pipeline_mode = #tpu.pipeline_mode<synchronous>, transform_indices = @transform_6, window_bounds = array<i64: 64, 32>}, {pipeline_mode = #tpu.pipeline_mode<synchronous>, transform_indices = @transform_7, window_bounds = array<i64: 1, 32>}, {pipeline_mode = #tpu.pipeline_mode<synchronous>, transform_indices = @transform_8, window_bounds = array<i64: 1, 32>}, {pipeline_mode = #tpu.pipeline_mode<synchronous>, transform_indices = @transform_9, window_bounds = array<i64: 1, 32>}, {pipeline_mode = #tpu.pipeline_mode<synchronous>, transform_indices = @transform_10, window_bounds = array<i64: 1, 64>}, {pipeline_mode = #tpu.pipeline_mode<synchronous>, transform_indices = @transform_11, window_bounds = array<i64: 1, 64>}, {pipeline_mode = #tpu.pipeline_mode<synchronous>, transform_indices = @transform_12, window_bounds = array<i64: 64, 32>}, {pipeline_mode = #tpu.pipeline_mode<synchronous>, transform_indices = @transform_13, window_bounds = array<i64: 1, 32>}, {pipeline_mode = #tpu.pipeline_mode<synchronous>, transform_indices = @transform_14, window_bounds = array<i64: 1, 32>}, {pipeline_mode = #tpu.pipeline_mode<synchronous>, transform_indices = @transform_15, window_bounds = array<i64: 1, 32>}, {pipeline_mode = #tpu.pipeline_mode<synchronous>, transform_indices = @transform_16, window_bounds = array<i64: 1, 32>}, {pipeline_mode = #tpu.pipeline_mode<synchronous>, transform_indices = @transform_17, window_bounds = array<i64: 1, 32>}, {transform_indices = @transform_18, window_bounds = array<i64: 1, 8, 32>}]} {
    %c0 = arith.constant 0 : index
    %c0_0 = arith.constant 0 : index
    %c0_1 = arith.constant 0 : index
    %0 = vector.load %arg2[%c0, %c0_0, %c0_1] : memref<1x8x64xf32, #tpu.memory_space<vmem>>, vector<1x8x64xf32>
    %1 = vector.shape_cast %0 : vector<1x8x64xf32> to vector<8x64xf32>
    %c0_2 = arith.constant 0 : index
    %c0_3 = arith.constant 0 : index
    %2 = vector.load %arg6[%c0_2, %c0_3] : memref<1x64xf32, #tpu.memory_space<vmem>>, vector<1x64xf32>
    %c0_4 = arith.constant 0 : index
    %c0_5 = arith.constant 0 : index
    %3 = vector.load %arg7[%c0_4, %c0_5] : memref<1x64xf32, #tpu.memory_space<vmem>>, vector<1x64xf32>
    %cst = arith.constant dense<0.000000e+00> : vector<8xf32>
    %4 = vector.multi_reduction <add>, %1, %cst [1] : vector<8x64xf32> to vector<8xf32>
    %5 = vector.shape_cast %4 : vector<8xf32> to vector<8x1xf32>
    %cst_6 = arith.constant 6.400000e+01 : f32
    %6 = vector.broadcast %cst_6 : f32 to vector<8x1xf32>
    %7 = arith.divf %5, %6 : vector<8x1xf32>
    %8 = vector.broadcast %7 : vector<8x1xf32> to vector<8x64xf32>
    %9 = arith.subf %1, %8 : vector<8x64xf32>
    %10 = arith.mulf %9, %9 : vector<8x64xf32>
    %cst_7 = arith.constant dense<0.000000e+00> : vector<8xf32>
    %11 = vector.multi_reduction <add>, %10, %cst_7 [1] : vector<8x64xf32> to vector<8xf32>
    %12 = vector.shape_cast %11 : vector<8xf32> to vector<8x1xf32>
    %cst_8 = arith.constant 6.400000e+01 : f32
    %13 = vector.broadcast %cst_8 : f32 to vector<8x1xf32>
    %14 = arith.divf %12, %13 : vector<8x1xf32>
    %cst_9 = arith.constant 9.99999996E-13 : f32
    %15 = vector.broadcast %cst_9 : f32 to vector<8x1xf32>
    %16 = arith.addf %14, %15 : vector<8x1xf32>
    %17 = math.rsqrt %16 : vector<8x1xf32>
    %18 = vector.broadcast %17 : vector<8x1xf32> to vector<8x64xf32>
    %19 = arith.mulf %9, %18 : vector<8x64xf32>
    %20 = vector.broadcast %2 : vector<1x64xf32> to vector<8x64xf32>
    %21 = arith.mulf %20, %19 : vector<8x64xf32>
    %22 = vector.broadcast %3 : vector<1x64xf32> to vector<8x64xf32>
    %23 = arith.addf %21, %22 : vector<8x64xf32>
    %c0_10 = arith.constant 0 : index
    %c0_11 = arith.constant 0 : index
    %24 = vector.load %arg8[%c0_10, %c0_11] : memref<64x32xf32, #tpu.memory_space<vmem>>, vector<64x32xf32>
    %cst_12 = arith.constant dense<0.000000e+00> : vector<8x32xf32>
    %25 = tpu.matmul %23, %24, %cst_12 {dimension_numbers = #tpu.dot_dimension_numbers<[1], [0], [0], [1], [0, 0, 1, 1], [], []>} : vector<8x64xf32>, vector<64x32xf32>, vector<8x32xf32> -> vector<8x32xf32>
    %c0_13 = arith.constant 0 : index
    %c0_14 = arith.constant 0 : index
    %26 = vector.load %arg9[%c0_13, %c0_14] : memref<1x32xf32, #tpu.memory_space<vmem>>, vector<1x32xf32>
    %27 = vector.broadcast %26 : vector<1x32xf32> to vector<8x32xf32>
    %28 = arith.addf %25, %27 : vector<8x32xf32>
    %cst_15 = arith.constant 0.000000e+00 : f32
    %29 = vector.broadcast %cst_15 : f32 to vector<8x32xf32>
    %30 = arith.maximumf %28, %29 : vector<8x32xf32>
    %c0_16 = arith.constant 0 : index
    %c0_17 = arith.constant 0 : index
    %31 = vector.load %arg10[%c0_16, %c0_17] : memref<1x32xf32, #tpu.memory_space<vmem>>, vector<1x32xf32>
    %c0_18 = arith.constant 0 : index
    %c0_19 = arith.constant 0 : index
    %32 = vector.load %arg11[%c0_18, %c0_19] : memref<1x32xf32, #tpu.memory_space<vmem>>, vector<1x32xf32>
    %cst_20 = arith.constant dense<0.000000e+00> : vector<8xf32>
    %33 = vector.multi_reduction <add>, %30, %cst_20 [1] : vector<8x32xf32> to vector<8xf32>
    %34 = vector.shape_cast %33 : vector<8xf32> to vector<8x1xf32>
    %cst_21 = arith.constant 3.200000e+01 : f32
    %35 = vector.broadcast %cst_21 : f32 to vector<8x1xf32>
    %36 = arith.divf %34, %35 : vector<8x1xf32>
    %37 = vector.broadcast %36 : vector<8x1xf32> to vector<8x32xf32>
    %38 = arith.subf %30, %37 : vector<8x32xf32>
    %39 = arith.mulf %38, %38 : vector<8x32xf32>
    %cst_22 = arith.constant dense<0.000000e+00> : vector<8xf32>
    %40 = vector.multi_reduction <add>, %39, %cst_22 [1] : vector<8x32xf32> to vector<8xf32>
    %41 = vector.shape_cast %40 : vector<8xf32> to vector<8x1xf32>
    %cst_23 = arith.constant 3.200000e+01 : f32
    %42 = vector.broadcast %cst_23 : f32 to vector<8x1xf32>
    %43 = arith.divf %41, %42 : vector<8x1xf32>
    %cst_24 = arith.constant 9.99999996E-13 : f32
    %44 = vector.broadcast %cst_24 : f32 to vector<8x1xf32>
    %45 = arith.addf %43, %44 : vector<8x1xf32>
    %46 = math.rsqrt %45 : vector<8x1xf32>
    %47 = vector.broadcast %46 : vector<8x1xf32> to vector<8x32xf32>
    %48 = arith.mulf %38, %47 : vector<8x32xf32>
    %49 = vector.broadcast %31 : vector<1x32xf32> to vector<8x32xf32>
    %50 = arith.mulf %49, %48 : vector<8x32xf32>
    %51 = vector.broadcast %32 : vector<1x32xf32> to vector<8x32xf32>
    %52 = arith.addf %50, %51 : vector<8x32xf32>
    %c0_25 = arith.constant 0 : index
    %c0_26 = arith.constant 0 : index
    %c0_27 = arith.constant 0 : index
    %53 = vector.load %arg3[%c0_25, %c0_26, %c0_27] : memref<1x8x64xf32, #tpu.memory_space<vmem>>, vector<1x8x64xf32>
    %54 = vector.shape_cast %53 : vector<1x8x64xf32> to vector<8x64xf32>
    %c0_28 = arith.constant 0 : index
    %c0_29 = arith.constant 0 : index
    %55 = vector.load %arg12[%c0_28, %c0_29] : memref<1x64xf32, #tpu.memory_space<vmem>>, vector<1x64xf32>
    %c0_30 = arith.constant 0 : index
    %c0_31 = arith.constant 0 : index
    %56 = vector.load %arg13[%c0_30, %c0_31] : memref<1x64xf32, #tpu.memory_space<vmem>>, vector<1x64xf32>
    %cst_32 = arith.constant dense<0.000000e+00> : vector<8xf32>
    %57 = vector.multi_reduction <add>, %54, %cst_32 [1] : vector<8x64xf32> to vector<8xf32>
    %58 = vector.shape_cast %57 : vector<8xf32> to vector<8x1xf32>
    %cst_33 = arith.constant 6.400000e+01 : f32
    %59 = vector.broadcast %cst_33 : f32 to vector<8x1xf32>
    %60 = arith.divf %58, %59 : vector<8x1xf32>
    %61 = vector.broadcast %60 : vector<8x1xf32> to vector<8x64xf32>
    %62 = arith.subf %54, %61 : vector<8x64xf32>
    %63 = arith.mulf %62, %62 : vector<8x64xf32>
    %cst_34 = arith.constant dense<0.000000e+00> : vector<8xf32>
    %64 = vector.multi_reduction <add>, %63, %cst_34 [1] : vector<8x64xf32> to vector<8xf32>
    %65 = vector.shape_cast %64 : vector<8xf32> to vector<8x1xf32>
    %cst_35 = arith.constant 6.400000e+01 : f32
    %66 = vector.broadcast %cst_35 : f32 to vector<8x1xf32>
    %67 = arith.divf %65, %66 : vector<8x1xf32>
    %cst_36 = arith.constant 9.99999996E-13 : f32
    %68 = vector.broadcast %cst_36 : f32 to vector<8x1xf32>
    %69 = arith.addf %67, %68 : vector<8x1xf32>
    %70 = math.rsqrt %69 : vector<8x1xf32>
    %71 = vector.broadcast %70 : vector<8x1xf32> to vector<8x64xf32>
    %72 = arith.mulf %62, %71 : vector<8x64xf32>
    %73 = vector.broadcast %55 : vector<1x64xf32> to vector<8x64xf32>
    %74 = arith.mulf %73, %72 : vector<8x64xf32>
    %75 = vector.broadcast %56 : vector<1x64xf32> to vector<8x64xf32>
    %76 = arith.addf %74, %75 : vector<8x64xf32>
    %c0_37 = arith.constant 0 : index
    %c0_38 = arith.constant 0 : index
    %77 = vector.load %arg14[%c0_37, %c0_38] : memref<64x32xf32, #tpu.memory_space<vmem>>, vector<64x32xf32>
    %cst_39 = arith.constant dense<0.000000e+00> : vector<8x32xf32>
    %78 = tpu.matmul %76, %77, %cst_39 {dimension_numbers = #tpu.dot_dimension_numbers<[1], [0], [0], [1], [0, 0, 1, 1], [], []>} : vector<8x64xf32>, vector<64x32xf32>, vector<8x32xf32> -> vector<8x32xf32>
    %c0_40 = arith.constant 0 : index
    %c0_41 = arith.constant 0 : index
    %79 = vector.load %arg15[%c0_40, %c0_41] : memref<1x32xf32, #tpu.memory_space<vmem>>, vector<1x32xf32>
    %80 = vector.broadcast %79 : vector<1x32xf32> to vector<8x32xf32>
    %81 = arith.addf %78, %80 : vector<8x32xf32>
    %cst_42 = arith.constant 0.000000e+00 : f32
    %82 = vector.broadcast %cst_42 : f32 to vector<8x32xf32>
    %83 = arith.maximumf %81, %82 : vector<8x32xf32>
    %c0_43 = arith.constant 0 : index
    %c0_44 = arith.constant 0 : index
    %84 = vector.load %arg16[%c0_43, %c0_44] : memref<1x32xf32, #tpu.memory_space<vmem>>, vector<1x32xf32>
    %c0_45 = arith.constant 0 : index
    %c0_46 = arith.constant 0 : index
    %85 = vector.load %arg17[%c0_45, %c0_46] : memref<1x32xf32, #tpu.memory_space<vmem>>, vector<1x32xf32>
    %cst_47 = arith.constant dense<0.000000e+00> : vector<8xf32>
    %86 = vector.multi_reduction <add>, %83, %cst_47 [1] : vector<8x32xf32> to vector<8xf32>
    %87 = vector.shape_cast %86 : vector<8xf32> to vector<8x1xf32>
    %cst_48 = arith.constant 3.200000e+01 : f32
    %88 = vector.broadcast %cst_48 : f32 to vector<8x1xf32>
    %89 = arith.divf %87, %88 : vector<8x1xf32>
    %90 = vector.broadcast %89 : vector<8x1xf32> to vector<8x32xf32>
    %91 = arith.subf %83, %90 : vector<8x32xf32>
    %92 = arith.mulf %91, %91 : vector<8x32xf32>
    %cst_49 = arith.constant dense<0.000000e+00> : vector<8xf32>
    %93 = vector.multi_reduction <add>, %92, %cst_49 [1] : vector<8x32xf32> to vector<8xf32>
    %94 = vector.shape_cast %93 : vector<8xf32> to vector<8x1xf32>
    %cst_50 = arith.constant 3.200000e+01 : f32
    %95 = vector.broadcast %cst_50 : f32 to vector<8x1xf32>
    %96 = arith.divf %94, %95 : vector<8x1xf32>
    %cst_51 = arith.constant 9.99999996E-13 : f32
    %97 = vector.broadcast %cst_51 : f32 to vector<8x1xf32>
    %98 = arith.addf %96, %97 : vector<8x1xf32>
    %99 = math.rsqrt %98 : vector<8x1xf32>
    %100 = vector.broadcast %99 : vector<8x1xf32> to vector<8x32xf32>
    %101 = arith.mulf %91, %100 : vector<8x32xf32>
    %102 = vector.broadcast %84 : vector<1x32xf32> to vector<8x32xf32>
    %103 = arith.mulf %102, %101 : vector<8x32xf32>
    %104 = vector.broadcast %85 : vector<1x32xf32> to vector<8x32xf32>
    %105 = arith.addf %103, %104 : vector<8x32xf32>
    %106 = arith.addf %52, %105 : vector<8x32xf32>
    %c0_52 = arith.constant 0 : index
    %c0_53 = arith.constant 0 : index
    %c0_54 = arith.constant 0 : index
    %107 = vector.load %arg4[%c0_52, %c0_53, %c0_54] : memref<1x8x32xf32, #tpu.memory_space<vmem>>, vector<1x8x32xf32>
    %108 = vector.shape_cast %107 : vector<1x8x32xf32> to vector<8x32xf32>
    %109 = arith.addf %106, %108 : vector<8x32xf32>
    %c0_55 = arith.constant 0 : index
    %c0_56 = arith.constant 0 : index
    %110 = vector.load %arg5[%c0_55, %c0_56] : memref<8x32xf32, #tpu.memory_space<vmem>>, vector<8x32xf32>
    %111 = arith.addf %109, %110 : vector<8x32xf32>
    %c0_57 = arith.constant 0 : index
    %c0_58 = arith.constant 0 : index
    %112 = vector.load %arg18[%c0_57, %c0_58] : memref<1x32xf32, #tpu.memory_space<vmem>>, vector<1x32xf32>
    %c0_59 = arith.constant 0 : index
    %c0_60 = arith.constant 0 : index
    %113 = vector.load %arg19[%c0_59, %c0_60] : memref<1x32xf32, #tpu.memory_space<vmem>>, vector<1x32xf32>
    %cst_61 = arith.constant dense<0.000000e+00> : vector<8xf32>
    %114 = vector.multi_reduction <add>, %111, %cst_61 [1] : vector<8x32xf32> to vector<8xf32>
    %115 = vector.shape_cast %114 : vector<8xf32> to vector<8x1xf32>
    %cst_62 = arith.constant 3.200000e+01 : f32
    %116 = vector.broadcast %cst_62 : f32 to vector<8x1xf32>
    %117 = arith.divf %115, %116 : vector<8x1xf32>
    %118 = vector.broadcast %117 : vector<8x1xf32> to vector<8x32xf32>
    %119 = arith.subf %111, %118 : vector<8x32xf32>
    %120 = arith.mulf %119, %119 : vector<8x32xf32>
    %cst_63 = arith.constant dense<0.000000e+00> : vector<8xf32>
    %121 = vector.multi_reduction <add>, %120, %cst_63 [1] : vector<8x32xf32> to vector<8xf32>
    %122 = vector.shape_cast %121 : vector<8xf32> to vector<8x1xf32>
    %cst_64 = arith.constant 3.200000e+01 : f32
    %123 = vector.broadcast %cst_64 : f32 to vector<8x1xf32>
    %124 = arith.divf %122, %123 : vector<8x1xf32>
    %cst_65 = arith.constant 9.99999996E-13 : f32
    %125 = vector.broadcast %cst_65 : f32 to vector<8x1xf32>
    %126 = arith.addf %124, %125 : vector<8x1xf32>
    %127 = math.rsqrt %126 : vector<8x1xf32>
    %128 = vector.broadcast %127 : vector<8x1xf32> to vector<8x32xf32>
    %129 = arith.mulf %119, %128 : vector<8x32xf32>
    %130 = vector.broadcast %112 : vector<1x32xf32> to vector<8x32xf32>
    %131 = arith.mulf %130, %129 : vector<8x32xf32>
    %132 = vector.broadcast %113 : vector<1x32xf32> to vector<8x32xf32>
    %133 = arith.addf %131, %132 : vector<8x32xf32>
    %c0_66 = arith.constant 0 : index
    %c0_67 = arith.constant 0 : index
    %c0_68 = arith.constant 0 : index
    %134 = vector.load %arg20[%c0_66, %c0_67, %c0_68] : memref<1x8x32xf32, #tpu.memory_space<vmem>>, vector<1x8x32xf32>
    %135 = vector.shape_cast %134 : vector<1x8x32xf32> to vector<8x32xf32>
    %136 = vector.shape_cast %133 : vector<8x32xf32> to vector<1x8x32xf32>
    tpu.vector_store %arg20[%c0_66, %c0_67, %c0_68], %136 {strides = array<i32>} : memref<1x8x32xf32, #tpu.memory_space<vmem>>, vector<1x8x32xf32>,
    return
  }
  func.func @transform_0(%arg0: i32, %arg1: i32) -> (i32, i32, i32) {
    %c0_i32 = arith.constant 0 : i32
    %c0_i32_0 = arith.constant 0 : i32
    return %arg0, %arg1, %c0_i32 : i32, i32, i32
  }
  func.func @transform_1(%arg0: i32, %arg1: i32) -> (i32, i32, i32) {
    %c0_i32 = arith.constant 0 : i32
    %c0_i32_0 = arith.constant 0 : i32
    return %arg0, %arg1, %c0_i32 : i32, i32, i32
  }
  func.func @transform_2(%arg0: i32, %arg1: i32) -> (i32, i32, i32) {
    %c0_i32 = arith.constant 0 : i32
    %c0_i32_0 = arith.constant 0 : i32
    return %arg0, %arg1, %c0_i32 : i32, i32, i32
  }
  func.func @transform_3(%arg0: i32, %arg1: i32) -> (i32, i32) {
    %c0_i32 = arith.constant 0 : i32
    %c0_i32_0 = arith.constant 0 : i32
    return %arg1, %c0_i32 : i32, i32
  }
  func.func @transform_4(%arg0: i32, %arg1: i32) -> (i32, i32) {
    %c0_i32 = arith.constant 0 : i32
    %c0_i32_0 = arith.constant 0 : i32
    %c0_i32_1 = arith.constant 0 : i32
    return %c0_i32, %c0_i32_0 : i32, i32
  }
  func.func @transform_5(%arg0: i32, %arg1: i32) -> (i32, i32) {
    %c0_i32 = arith.constant 0 : i32
    %c0_i32_0 = arith.constant 0 : i32
    %c0_i32_1 = arith.constant 0 : i32
    return %c0_i32, %c0_i32_0 : i32, i32
  }
  func.func @transform_6(%arg0: i32, %arg1: i32) -> (i32, i32) {
    %c0_i32 = arith.constant 0 : i32
    %c0_i32_0 = arith.constant 0 : i32
    %c0_i32_1 = arith.constant 0 : i32
    return %c0_i32, %c0_i32_0 : i32, i32
  }
  func.func @transform_7(%arg0: i32, %arg1: i32) -> (i32, i32) {
    %c0_i32 = arith.constant 0 : i32
    %c0_i32_0 = arith.constant 0 : i32
    %c0_i32_1 = arith.constant 0 : i32
    return %c0_i32, %c0_i32_0 : i32, i32
  }
  func.func @transform_8(%arg0: i32, %arg1: i32) -> (i32, i32) {
    %c0_i32 = arith.constant 0 : i32
    %c0_i32_0 = arith.constant 0 : i32
    %c0_i32_1 = arith.constant 0 : i32
    return %c0_i32, %c0_i32_0 : i32, i32
  }
  func.func @transform_9(%arg0: i32, %arg1: i32) -> (i32, i32) {
    %c0_i32 = arith.constant 0 : i32
    %c0_i32_0 = arith.constant 0 : i32
    %c0_i32_1 = arith.constant 0 : i32
    return %c0_i32, %c0_i32_0 : i32, i32
  }
  func.func @transform_10(%arg0: i32, %arg1: i32) -> (i32, i32) {
    %c0_i32 = arith.constant 0 : i32
    %c0_i32_0 = arith.constant 0 : i32
    %c0_i32_1 = arith.constant 0 : i32
    return %c0_i32, %c0_i32_0 : i32, i32
  }
  func.func @transform_11(%arg0: i32, %arg1: i32) -> (i32, i32) {
    %c0_i32 = arith.constant 0 : i32
    %c0_i32_0 = arith.constant 0 : i32
    %c0_i32_1 = arith.constant 0 : i32
    return %c0_i32, %c0_i32_0 : i32, i32
  }
  func.func @transform_12(%arg0: i32, %arg1: i32) -> (i32, i32) {
    %c0_i32 = arith.constant 0 : i32
    %c0_i32_0 = arith.constant 0 : i32
    %c0_i32_1 = arith.constant 0 : i32
    return %c0_i32, %c0_i32_0 : i32, i32
  }
  func.func @transform_13(%arg0: i32, %arg1: i32) -> (i32, i32) {
    %c0_i32 = arith.constant 0 : i32
    %c0_i32_0 = arith.constant 0 : i32
    %c0_i32_1 = arith.constant 0 : i32
    return %c0_i32, %c0_i32_0 : i32, i32
  }
  func.func @transform_14(%arg0: i32, %arg1: i32) -> (i32, i32) {
    %c0_i32 = arith.constant 0 : i32
    %c0_i32_0 = arith.constant 0 : i32
    %c0_i32_1 = arith.constant 0 : i32
    return %c0_i32, %c0_i32_0 : i32, i32
  }
  func.func @transform_15(%arg0: i32, %arg1: i32) -> (i32, i32) {
    %c0_i32 = arith.constant 0 : i32
    %c0_i32_0 = arith.constant 0 : i32
    %c0_i32_1 = arith.constant 0 : i32
    return %c0_i32, %c0_i32_0 : i32, i32
  }
  func.func @transform_16(%arg0: i32, %arg1: i32) -> (i32, i32) {
    %c0_i32 = arith.constant 0 : i32
    %c0_i32_0 = arith.constant 0 : i32
    %c0_i32_1 = arith.constant 0 : i32
    return %c0_i32, %c0_i32_0 : i32, i32
  }
  func.func @transform_17(%arg0: i32, %arg1: i32) -> (i32, i32) {
    %c0_i32 = arith.constant 0 : i32
    %c0_i32_0 = arith.constant 0 : i32
    %c0_i32_1 = arith.constant 0 : i32
    return %c0_i32, %c0_i32_0 : i32, i32
  }
  func.func @transform_18(%arg0: i32, %arg1: i32) -> (i32, i32, i32) {
    %c0_i32 = arith.constant 0 : i32
    %c0_i32_0 = arith.constant 0 : i32
    return %arg0, %arg1, %c0_i32 : i32, i32, i32
  }
}

</mosaic_0001>

<bundles_post_ra>
// kernel: tpu_custom_call.1
= control target key start
LH: loop header
LB: loop body
LE: loop exit
PB: predicated region body
PF: predicated region fallthrough
CT: control target
= control target key end

     0   :  { %s1684_s0 = inlined_call_operand.vmem [shape: f32[2,8,64], index: 0, kind: input, shape index: {}]   ;;  %s1685_s1 = inlined_call_operand.vmem [shape: f32[2,8,64], index: 1, kind: input, shape index: {}]   ;;  %s1686_s2 = inlined_call_operand.vmem [shape: f32[2,8,32], index: 2, kind: input, shape index: {}]   ;;  %s1687_s3 = inlined_call_operand.vmem [shape: f32[64,32], index: 3, kind: input, shape index: {}]   ;;  %s1688_s4 = inlined_call_operand.vmem [shape: f32[1,64], index: 4, kind: input, shape index: {}]   ;;  %s1689_s5 = inlined_call_operand.vmem [shape: f32[1,64], index: 5, kind: input, shape index: {}]   ;;  %s1690_s6 = inlined_call_operand.vmem [shape: f32[64,32], index: 6, kind: input, shape index: {}]   ;;  %s1691_s7 = inlined_call_operand.vmem [shape: f32[1,32], index: 7, kind: input, shape index: {}]   ;;  %s1692_s8 = inlined_call_operand.vmem [shape: f32[1,32], index: 8, kind: input, shape index: {}]   ;;  %s1693_s9 = inlined_call_operand.vmem [shape: f32[1,32], index: 9, kind: input, shape index: {}]   ;;  %s1694_s10 = inlined_call_operand.vmem [shape: f32[1,64], index: 10, kind: input, shape index: {}]   ;;  %s1695_s11 = inlined_call_operand.vmem [shape: f32[1,64], index: 11, kind: input, shape index: {}]   ;;  %s1696_s12 = inlined_call_operand.vmem [shape: f32[64,32], index: 12, kind: input, shape index: {}]   ;;  %s1697_s13 = inlined_call_operand.vmem [shape: f32[1,32], index: 13, kind: input, shape index: {}]   ;;  %s1698_s14 = inlined_call_operand.vmem [shape: f32[1,32], index: 14, kind: input, shape index: {}]   ;;  %s1699_s15 = inlined_call_operand.vmem [shape: f32[1,32], index: 15, kind: input, shape index: {}]   ;;  %s1700_s16 = inlined_call_operand.vmem [shape: f32[1,32], index: 16, kind: input, shape index: {}]   ;;  %s1701_s17 = inlined_call_operand.vmem [shape: f32[1,32], index: 17, kind: input, shape index: {}]   ;;  %s1702_s18 = inlined_call_operand.hbm [shape: f32[2,8,32], index: 18, kind: output, shape index: {}]  }
   0x1   :  { %1707 = sst [smem:[#allocation10_spill]] %s1684_s0 }
   0x2   :  { %1708 = sst [smem:[#allocation11_spill]] %s1685_s1 }
   0x3   :  { %1709 = sst [smem:[#allocation12_spill]] %s1686_s2 }
   0x4   :  { %1710 = sst [smem:[#allocation13_spill]] %s1687_s3 }
   0x5   :  { %1711 = sst [smem:[#allocation14_spill]] %s1688_s4 }
   0x6   :  { %1712 = sst [smem:[#allocation15_spill]] %s1689_s5 }
   0x7   :  { %23 = vsyncpa [#allocation3], 0 }
   0x8   :  { %25 = vsyncpa [#allocation3 + $0x1], 0  ;;  %s1462_s27 = smov 0   ;;  %s1464_s28 = smov 0  }
   0x9   :  { %s1466_s29 = smov 0   ;;  %s1468_s30 = smov 0  }
   0xa   :  { %s1470_s0 = smov 0   ;;  %s1472_s19 = smov 0  }
   0xb LB: > { %1713 = sst [smem:[#allocation5_spill]] %s1342_s27  ;;  %s1135_s1 = sadd.s32 4294967295, %s1362_s19   ;;  %s1362_s19 = sphi %s1472_s19, %s31_s19   ;;  %s1358_s0 = sphi %s1470_s0, %s1730_s0   ;;  %s1354_s30 = sphi %s1468_s30, %s1734_s30   ;;  %s1350_s29 = sphi %s1466_s29, %s1733_s29   ;;  %s1346_s28 = sphi %s1464_s28, %s1732_s28   ;;  %s1342_s27 = sphi %s1462_s27, %s1731_s27  }
   0xc   : > { %1714 = sst [smem:[#allocation6_spill]] %s1358_s0  ;;  %s1136_s20 = sadd.s32 4294967294, %s1362_s19  }
   0xd   : > { %s43_s21 = sadd.s32 1, %s1358_s0  ;;  %s456_s22 = sadd.s32 1, %s1350_s29 }
   0xe   : > { %p45_p0 = scmp.ge.s32.totalorder %s43_s21, 2  ;;  %p466_p1 = scmp.ne.s32.totalorder %s1350_s29, %s1346_s28 }
   0xf   : > { %p467_p2 = scmp.eq.s32.totalorder %s1135_s1, 1  ;;  %p472_p3 = scmp.ne.s32.totalorder %s1346_s28, %s1342_s27 }
  0x10   : > { %s1736_s21 = smov (%p45_p0, %s43_s21), 0  ;;  %p473_p5 = scmp.eq.s32.totalorder %s1136_s20, 1 }
  0x11   : > { %1715 = sst [smem:[#allocation7_spill]] %s1736_s21  ;;  %p1502_p4 = por %p467_p2, %p466_p1 }
  0x12   : > { %s451_s23 = ssub.s32 %s1358_s0, %s1736_s21  ;;  %p1140_p6 = scmp.ge.s32.totalorder %s1362_s19, 1 }
  0x13   : > { %p454_p7 = scmp.eq.s32.totalorder %s451_s23, 0  ;;  %p1509_p8 = por %p473_p5, %p472_p3 }
  0x14   : > { %p570_p9 = scmp.lt.s32.totalorder %s1362_s19, 3 }
  0x15   : > { %s1717_s24 = scalar_select %p1509_p8, 1, 0 }
  0x16   : > { %s1515_s25 = scalar_select %p454_p7, %s1350_s29, %s456_s22  }
  0x17   : > { %1718 = sst [smem:[#allocation8_spill]] %s1717_s24  ;;  %p571_p10 = pnand %p1140_p6, %p570_p9 }
  0x18   : > { %1719 = sst [smem:[#allocation9_spill]] %s1515_s25  ;;  %p644_p11 = scmp.lt.s32.totalorder (!%p571_p10), %s1354_s30, 1 }
  0x19   : > { %574 = sbr.rel (%p571_p10) target bundleno = 1179 (0x49b), region = 92  ;;  %s1720_s21 = sld [smem:[#allocation10_spill]] (!%p571_p10) }
  0x1a   : > { %s1721_s22 = sld [smem:[#allocation11_spill]] (!%p571_p10) }
  0x1b   : > { %s1722_s4 = sld [smem:[#allocation14_spill]] (!%p571_p10) }
  0x1c   : > { %s1723_s5 = sld [smem:[#allocation15_spill]] (!%p571_p10) }
  0x1d   : > { %s1725_s3 = sld [smem:[#allocation13_spill]] (!%p571_p10) }
  0x1e   : > { %s645_s26 = scalar_select %p644_p11, %s1354_s30, 1  ;;  %vm672_vm0 = vcmask 523264   ;;  %v1364_v14 = vmov 0.0   ;;  %v708_v15 = vld [vmem:[%s1690_s6 + $0x38] sm:$0xff]  ;;  %v707_v16 = vld [vmem:[%s1690_s6 + $0x30] sm:$0xff]  ;;  %vm1365_vm1 = vmmov 0  }
  0x1f   : > { %1181 = vmatprep.subr.mxu0 %v1364_v14  ;;  %1200 = vmatprep.subr.mxu1 %v1364_v14  ;;  %v858_v17 = vld [vmem:[%s1696_s12 + $0x38] sm:$0xff]  ;;  %v857_v18 = vld [vmem:[%s1696_s12 + $0x30] sm:$0xff]  ;;  %v706_v19 = vld [vmem:[%s1690_s6 + $0x28] sm:$0xff]  ;;  %vm792_vm2 = vcmask 261120  }
  0x20   : > { %s1519_s1 = sshll.u32 %s645_s26, 3  ;;  %1182 = vmatpush3.msra.mxu0 %v708_v15  ;;  %1197 = vmatprep.mubr.msk.f32.mxu0 %vm1365_vm1, %v1364_v14  ;;  %v856_v20 = vld [vmem:[%s1696_s12 + $0x28] sm:$0xff]  ;;  %v705_v21 = vld [vmem:[%s1690_s6 + $0x20] sm:$0xff]  ;;  %v704_v23 = vld [vmem:[%s1690_s6 + $0x18] sm:$0xff]  ;;  %s1160_s26 = sshll.u32 %s1354_s30, 7 }
  0x21   : > { %s650_s0 = scalar_lea.vmem %s1720_s21, %s1519_s1  ;;  %s657_s25 = scalar_lea.vmem %s1721_s22, %s1519_s1  ;;  %1183 = vmatprep.subr.mxu0 %v1364_v14  ;;  %1201 = vmatpush3.msra.mxu1 %v858_v17  ;;  %v855_v22 = vld [vmem:[%s1696_s12 + $0x20] sm:$0xff]  ;;  %v854_v24 = vld [vmem:[%s1696_s12 + $0x18] sm:$0xff]  ;;  %v703_v25 = vld [vmem:[%s1690_s6 + $0x10] sm:$0xff] }
  0x22   : > { %v669_v0 = vld [vmem:[%s650_s0] sm:$0xff]  ;;  %1184 = vmatpush3.msra.mxu0 %v707_v16  ;;  %1202 = vmatprep.subr.mxu1 %v1364_v14  ;;  %v853_v26 = vld [vmem:[%s1696_s12 + $0x10] sm:$0xff]  ;;  %v702_v27 = vld [vmem:[%s1690_s6 + $0x8] sm:$0xff]  ;;  %s1017_s0 = scalar_lea.hbm %s1702_s18, %s1160_s26  ;;  %s1366_s21 = smov [#allocation2]  }
  0x23   : > { %v673_v1 = vsel %vm672_vm0, %v669_v0, 0.0  ;;  %v821_v2 = vld [vmem:[%s657_s25] sm:$0xff]  ;;  %1185 = vmatprep.subr.mxu0 %v1364_v14  ;;  %1203 = vmatpush3.msra.mxu1 %v857_v18  ;;  %v852_v29 = vld [vmem:[%s1696_s12 + $0x8] sm:$0xff]  ;;  %s1290_s24 = sshll.u32 %s1366_s21, 4  ;;  %s1291_s24 = int_to_ptr.vmem [resolvable:$false] %s1290_s24 }
  0x24   : > { %674 = vadd.xlane.f32.xlu0 %v673_v1  ;;  %v824_v3 = vsel %vm672_vm0, %v821_v2, 0.0  ;;  %1186 = vmatpush3.msra.mxu0 %v706_v19  ;;  %v701_v28 = vld [vmem:[%s1690_s6] sm:$0xff]  ;;  %s1292_s30 = scalar_lea.vmem %s1291_s24, 256 }
  0x25   : > { %1204 = vmatprep.subr.mxu1 %v1364_v14  ;;  %1187 = vmatprep.subr.mxu0 %v1364_v14  ;;  %v851_v30 = vld [vmem:[%s1696_s12] sm:$0xff] }
  0x26   : > { %1205 = vmatpush3.msra.mxu1 %v856_v20  ;;  %1188 = vmatpush3.msra.mxu0 %v705_v21  ;;  %v1145_v38 = vld [vmem:[%s1722_s4] ss:$0 sm:$0xff]  ;;  %s641_s4 = sand.u32 1, %s1346_s28  }
  0x27   : > { %1206 = vmatprep.subr.mxu1 %v1364_v14  ;;  %1189 = vmatprep.subr.mxu0 %v1364_v14  ;;  %v1146_v40 = vld [vmem:[%s1723_s5] ss:$0 sm:$0xff]  ;;  %s1724_s5 = sld [smem:[#allocation12_spill]] }
  0x28   : > { %825 = vadd.xlane.f32.xlu0 %v824_v3  ;;  %1207 = vmatpush3.msra.mxu1 %v855_v22  ;;  %v1151_v43 = vld [vmem:[%s1694_s10] ss:$0 sm:$0xff] }
  0x29   : > { %1190 = vmatpush3.msra.mxu0 %v704_v23  ;;  %1208 = vmatprep.subr.mxu1 %v1364_v14  ;;  %v1152_v46 = vld [vmem:[%s1695_s11] ss:$0 sm:$0xff] }
  0x2a   : > { %1191 = vmatprep.subr.mxu0 %v1364_v14  ;;  %1209 = vmatpush3.msra.mxu1 %v854_v24  ;;  %v1147_v49 = vld [vmem:[%s1691_s7] ss:$0 sm:$0xff] }
  0x2b   : > { %1192 = vmatpush3.msra.mxu0 %v703_v25  ;;  %1210 = vmatprep.subr.mxu1 %v1364_v14  ;;  %v1153_v53 = vld [vmem:[%s1697_s13] ss:$0 sm:$0xff] }
  0x2c   : > { %1193 = vmatprep.subr.mxu0 %v1364_v14  ;;  %1211 = vmatpush3.msra.mxu1 %v853_v26  ;;  %v1149_v15 = vld [vmem:[%s1692_s8] ss:$0 sm:$0xff] }
  0x2d   : > { %1194 = vmatpush3.msra.mxu0 %v702_v27  ;;  %1212 = vmatprep.subr.mxu1 %v1364_v14  ;;  %v1155_v17 = vld [vmem:[%s1698_s14] ss:$0 sm:$0xff]  ;;  %s664_s22 = scalar_lea.vmem %s1724_s5, %s1519_s1  ;;  %s1141_s5 = sshll.u32 %s641_s4, 3 }
  0x2e   : > { %1195 = vmatprep.subr.mxu0 %v1364_v14  ;;  %1216 = vmatprep.mubr.msk.f32.mxu1 %vm1365_vm1, %v1364_v14  ;;  %v1150_v20 = vld [vmem:[%s1693_s9] ss:$0 sm:$0xff]  ;;  %s643_s20 = scalar_lea.vmem [#allocation2], %s1141_s5 }
  0x2f   : > { %1196 = vmatpush3.msra.mxu0 %v701_v28  ;;  %1213 = vmatpush3.msra.mxu1 %v852_v29  ;;  %v1156_v21 = vld [vmem:[%s1699_s15] ss:$0 sm:$0xff]  ;;  %s1019_s23 = sshll.u32 %s643_s20, 4  ;;  %s1020_s23 = int_to_ptr.vmem [resolvable:$true] %s1019_s23 }
  0x30   : > { %1214 = vmatprep.subr.mxu1 %v1364_v14  ;;  %v970_v25 = vld [vmem:[%s664_s22] sm:$0xff]  ;;  %s1286_s1 = scalar_lea.vmem %s1020_s23, 128  ;;  %p1293_p1 = scmp.lt.s32.totalorder %s1020_s23, %s1291_s24 }
  0x31   : > { %1215 = vmatpush3.msra.mxu1 %v851_v30  ;;  %v972_v27 = vld [vmem:[%s1725_s3] sm:$0xff]  ;;  %s1005_s3 = scalar_lea.sflag [#allocation3], %s641_s4  ;;  %p1287_p12 = scmp.ne.s32.totalorder %s1020_s23, %s1286_s1 }
  0x32   : > { %p1294_p2 = scmp.lt.s32.totalorder %s1292_s30, %s1286_s1 }
  0x33   : > { %p1288_p13 = pnand %p1287_p12, %p1502_p4 }
  0x34   : > { %p1295_p3 = por %p1294_p2, %p1293_p1 }
  0x35   : > { %p1289_p0 = pneg %p1288_p13 }
  0x37   : > { %p1296_p5 = pnand %p1295_p3, %p1289_p0 }
  0xad   : > { %v675_v4 = vpop.xlane.xlu0 %674 }
  0xae   : > { %v677_v5 = vmul.f32 0.015625, %v675_v4 }
  0xb0   : > { %v1531_v6 = vsub.f32 %v669_v0, %v677_v5 }
  0xb1   : > { %v826_v7 = vpop.xlane.xlu0 %825 }
  0xb2   : > { %v827_v8 = vmul.f32 0.015625, %v826_v7  ;;  %v679_v9 = vmul.f32 %v1531_v6, %v1531_v6 }
  0xb4   : > { %v1535_v10 = vsub.f32 %v821_v2, %v827_v8  ;;  %v680_v11 = vsel %vm672_vm0, %v679_v9, 0.0 }
  0xb5   : > { %681 = vadd.xlane.f32.xlu1 %v680_v11 }
  0xb6   : > { %v829_v12 = vmul.f32 %v1535_v10, %v1535_v10 }
  0xb8   : > { %v830_v13 = vsel %vm672_vm0, %v829_v12, 0.0 }
  0xb9   : > { %831 = vadd.xlane.f32.xlu1 %v830_v13 }
 0x13e   : > { %v682_v31 = vpop.xlane.xlu1 %681 }
 0x13f   : > { %v683_v32 = vmul.f32 0.015625, %v682_v31 }
 0x141   : > { %v684_v33 = vadd.f32 1e-12, %v683_v32 }
 0x142   : > { %v832_v34 = vpop.xlane.xlu1 %831 }
 0x143   : > { %1276 = vrsqrt.f32 %v684_v33  ;;  %v833_v35 = vmul.f32 0.015625, %v832_v34 }
 0x145   : > { %v834_v36 = vadd.f32 1e-12, %v833_v35 }
 0x147   : > { %1278 = vrsqrt.f32 %v834_v36 }
 0x150   : > { %v1277_v37 = vpop.eup %1276 }
 0x151   : > { %v686_v39 = vmul.f32 %v1277_v37, %v1531_v6 }
 0x153   : > { %v693_v41 = vmul.f32 %v1145_v38, %v686_v39 }
 0x154   : > { %v1279_v42 = vpop.eup %1278 }
 0x155   : > { %v700_v44 = vadd.f32 %v1146_v40, %v693_v41  ;;  %v836_v45 = vmul.f32 %v1279_v42, %v1535_v10  ;;  %v1157_v40 = vld [vmem:[%s1700_s16] ss:$0 sm:$0xff] }
 0x156   : > { %v1158_v42 = vld [vmem:[%s1701_s17] ss:$0 sm:$0xff] }
 0x157   : > { %1198 = vmatmul.mubr.msk.f32.vlgmr.msra.gmra.mxu0 %vm672_vm0, %v700_v44  ;;  %v843_v47 = vmul.f32 %v1151_v43, %v836_v45 }
 0x159   : > { %v850_v48 = vadd.f32 %v1152_v46, %v843_v47 }
 0x15b   : > { %1217 = vmatmul.mubr.msk.f32.vlgmr.msra.gmra.mxu1 %vm672_vm0, %v850_v48 }
 0x217   : > { %v785_v50 = vpop.f32.mrf.mxu0 }
 0x218   : > { %v786_v51 = vadd.f32 %v1147_v49, %v785_v50 }
 0x219   : > { %v1199_v52 = vpop.f32.mrf.mxu0 }
 0x21a   : > { %v789_v54 = vmax.f32 %v786_v51, 0.0 }
 0x21b   : > { %v935_v55 = vpop.f32.mrf.mxu1 }
 0x21c   : > { %v936_v56 = vadd.f32 %v1153_v53, %v935_v55  ;;  %v793_v57 = vsel %vm792_vm2, %v789_v54, 0.0 }
 0x21d   : > { %794 = vadd.xlane.f32.xlu0 %v793_v57  ;;  %v1218_v58 = vpop.f32.mrf.mxu1 }
 0x21e   : > { %v939_v59 = vmax.f32 %v936_v56, 0.0 }
 0x220   : > { %v942_v60 = vsel %vm792_vm2, %v939_v59, 0.0 }
 0x221   : > { %943 = vadd.xlane.f32.xlu1 %v942_v60 }
 0x2a6   : > { %v795_v61 = vpop.xlane.xlu0 %794 }
 0x2a7   : > { %v797_v62 = vmul.f32 0.03125, %v795_v61 }
 0x2a9   : > { %v798_v63 = vsub.f32 %v789_v54, %v797_v62 }
 0x2aa   : > { %v944_v0 = vpop.xlane.xlu1 %943 }
 0x2ab   : > { %v945_v1 = vmul.f32 0.03125, %v944_v0  ;;  %v799_v2 = vmul.f32 %v798_v63, %v798_v63 }
 0x2ad   : > { %v946_v3 = vsub.f32 %v939_v59, %v945_v1  ;;  %v800_v4 = vsel %vm792_vm2, %v799_v2, 0.0 }
 0x2ae   : > { %801 = vadd.xlane.f32.xlu0 %v800_v4 }
 0x2af   : > { %v947_v5 = vmul.f32 %v946_v3, %v946_v3 }
 0x2b1   : > { %v948_v6 = vsel %vm792_vm2, %v947_v5, 0.0 }
 0x2b2   : > { %949 = vadd.xlane.f32.xlu1 %v948_v6 }
 0x337   : > { %v802_v7 = vpop.xlane.xlu0 %801 }
 0x338   : > { %v803_v8 = vmul.f32 0.03125, %v802_v7 }
 0x33a   : > { %v804_v9 = vadd.f32 1e-12, %v803_v8 }
 0x33b   : > { %v950_v10 = vpop.xlane.xlu1 %949 }
 0x33c   : > { %1280 = vrsqrt.f32 %v804_v9  ;;  %v951_v11 = vmul.f32 0.03125, %v950_v10 }
 0x33e   : > { %v952_v12 = vadd.f32 1e-12, %v951_v11 }
 0x340   : > { %1282 = vrsqrt.f32 %v952_v12 }
 0x349   : > { %v1281_v13 = vpop.eup %1280 }
 0x34a   : > { %v806_v14 = vmul.f32 %v1281_v13, %v798_v63 }
 0x34c   : > { %v813_v18 = vmul.f32 %v1149_v15, %v806_v14 }
 0x34d   : > { %v1283_v16 = vpop.eup %1282 }
 0x34e   : > { %v954_v19 = vmul.f32 %v1283_v16, %v946_v3  ;;  %v820_v23 = vadd.f32 %v1150_v20, %v813_v18 }
 0x350   : > { %v961_v22 = vmul.f32 %v1155_v17, %v954_v19 }
 0x352   : > { %v968_v24 = vadd.f32 %v1156_v21, %v961_v22 }
 0x354   : > { %v969_v26 = vadd.f32 %v968_v24, %v820_v23 }
 0x356   : > { %v971_v28 = vadd.f32 %v970_v25, %v969_v26 }
 0x358   : > { %v973_v29 = vadd.f32 %v972_v27, %v971_v28 }
 0x35a   : > { %v976_v30 = vsel %vm792_vm2, %v973_v29, 0.0 }
 0x35b   : > { %977 = vadd.xlane.f32.xlu0 %v976_v30 }
 0x3e4   : > { %v978_v31 = vpop.xlane.xlu0 %977 }
 0x3e5   : > { %v979_v32 = vmul.f32 0.03125, %v978_v31 }
 0x3e7   : > { %v980_v33 = vsub.f32 %v973_v29, %v979_v32 }
 0x3e9   : > { %v981_v34 = vmul.f32 %v980_v33, %v980_v33 }
 0x3eb   : > { %v982_v35 = vsel %vm792_vm2, %v981_v34, 0.0 }
 0x3ec   : > { %983 = vadd.xlane.f32.xlu1 %v982_v35 }
 0x475   : > { %v984_v36 = vpop.xlane.xlu1 %983 }
 0x476   : > { %v985_v37 = vmul.f32 0.03125, %v984_v36 }
 0x478   : > { %v986_v38 = vadd.f32 1e-12, %v985_v37 }
 0x47a   : > { %1284 = vrsqrt.f32 %v986_v38 }
 0x487   : > { %v1285_v39 = vpop.eup %1284 }
 0x488   : > { %v988_v41 = vmul.f32 %v1285_v39, %v980_v33 }
 0x48a   : > { %v995_v43 = vmul.f32 %v1157_v40, %v988_v41 }
 0x48c   : > { %v1002_v44 = vadd.f32 %v1158_v42, %v995_v43 }
 0x48e   : > { %1003 = vst.msk [vmem:[%s643_s20] sm:$0xff] %vm792_vm2, %v1002_v44 }
 0x48f   : > { %1299 = shalt.err (!%p1296_p5)
}
 0x490   : > { %s1300_s5 = scalar_lea.hbm %s1017_s0, 128  ;;  %s1304_s26 = scalar_lea.hbm %s1702_s18, 256 }
 0x491   : > { %p1301_p6 = scmp.ne.s32.totalorder %s1017_s0, %s1300_s5  ;;  %p1305_p10 = scmp.lt.s32.totalorder %s1017_s0, %s1702_s18 }
 0x492   : > { %p1306_p11 = scmp.lt.s32.totalorder %s1304_s26, %s1300_s5 }
 0x493   : > { %p1302_p7 = pnand %p1301_p6, %p1502_p4 }
 0x494   : > { %p1307_p12 = por %p1306_p11, %p1305_p10 }
 0x495   : > { %p1303_p9 = pneg %p1302_p7 }
 0x497   : > { %p1308_p13 = pnand %p1307_p12, %p1303_p9 }
 0x499   : > { %1311 = shalt.err (!%p1308_p13)
}
 0x49a   : > { %1219 = dma.vmem_to_hbm [thread:$0]  (%p1502_p4), %s1020_s23, 128, %s1017_s0, %s1005_s3  }
 0x49b PF: > { %s1726_s27 = sld [smem:[#allocation5_spill]]  ;;  %p1225_p0 = scmp.ge.s32.totalorder %s1362_s19, 2 }
 0x49d   : > { %p1222_p1 = pnand %p1225_p0, %p1509_p8 }
 0x49f   : > { %p1223_p2 = pneg %p1222_p1 }
 0x4a1   : > { %s1031_s21 = sand.u32 1, %s1726_s27  }
 0x4a2   : > { %s1032_s24 = scalar_lea.sflag [#allocation3], %s1031_s21 }
 0x4a3   : > { %1337 = dma.done.wait (%p1223_p2), %s1032_s24, 128  }
 0x4a4   : > { %1339 = vsyncadd (%p1223_p2), %s1032_s24, 4294967168  ;;  %s31_s19 = sadd.s32 1, %s1362_s19   ;;  %s1728_s30 = sld [smem:[#allocation9_spill]] }
 0x4a5   : > { %p28_p3 = scmp.ge.s32.totalorder %s31_s19, 4   ;;  %s1729_s2 = sld [smem:[#allocation6_spill]] }
 0x4a6   : > { %s1730_s0 = sld [smem:[#allocation7_spill]]  ;;  %s1731_s27 = smov %s1346_s28 }
 0x4a7   : > { %s1732_s28 = smov %s1350_s29  ;;  %30 = sbr.rel (!%p28_p3) target bundleno = 11 (0xb), region = 136 }
 0x4aa   : > { %s1733_s29 = smov %s1728_s30 }
 0x4ab   : > { %s1734_s30 = smov %s1729_s2 }
 0x4ac   :  { %1037 = vsyncpa [#allocation3], 1 }
 0x4ad   :  { %1039 = vsyncpa [#allocation3 + $0x1], 1 }

</bundles_post_ra>
